<compile_context>
chip_gen: v5e
topology: v5e:2x2
jax: 0.10.0
libtpu: 0.0.40
codegen_flags: <defaults>
</compile_context>

<pallas_src>
import functools

import jax
import jax.numpy as jnp
from jax.experimental import pallas as pl
from jax.experimental.pallas import tpu as pltpu


def _classifier_head_kernel(x_ref, w_ref, b_ref, o_ref, acc_ref, *, inv_s):
    # x_ref: (Bt, St, C) spatial tile (input dtype)
    # w_ref: (C, N) f32 (Linear weight, transposed)
    # b_ref: (1, N) f32
    # o_ref: (Bt, N) output logits (resident across the reduction axis)
    # acc_ref: (Bt, C) f32 running spatial sum (scratch, persists across grid)
    k = pl.program_id(1)

    @pl.when(k == 0)
    def _init():
        acc_ref[...] = jnp.zeros_like(acc_ref)

    # Sublane reduction over the spatial tile; C stays on the lane axis (VPU adds).
    acc_ref[...] += jnp.sum(x_ref[...].astype(jnp.float32), axis=1)

    @pl.when(k == pl.num_programs(1) - 1)
    def _finalize():
        pooled = acc_ref[...] * inv_s  # single 1/S scale at finalize
        logits = jnp.dot(pooled, w_ref[...],
                         preferred_element_type=jnp.float32)
        o_ref[...] = (logits + b_ref[...]).astype(o_ref.dtype)


def classifier_head(x, weight, bias, *, target_tile_bytes=4 * 1024 * 1024):
    """
    x:      (B, C, D, H, W)  -- NCDHW, matching the PyTorch module
    weight: (num_classes, C) -- nn.Linear weight
    bias:   (num_classes,)   -- nn.Linear bias
    returns (B, num_classes)
    """
    B, C, D, H, W = x.shape
    N = weight.shape[0]
    S = D * H * W
    itemsize = jnp.dtype(x.dtype).itemsize

    # Channels-last layout so C sits on lanes inside the kernel.
    # (In a real pipeline the backbone would ideally emit channels-last directly.)
    x_bsc = jnp.transpose(x.reshape(B, C, S), (0, 2, 1))  # (B, S, C)

    # ---- batch tiling ----
    if B <= 8:
        Bt = B                      # block equals full dim -> layout-legal
    else:
        Bt = 8                      # multiple of 8 (sublane) for larger batches
    Bpad = pl.cdiv(B, Bt) * Bt

    # ---- spatial tile: multiple of 8 sublanes, a few MiB per buffer ----
    St = target_tile_bytes // max(1, Bt * C * itemsize)
    St = max(8, min(S, St))
    St = max(8, (St // 8) * 8)
    Spad = pl.cdiv(S, St) * St

    if Bpad != B or Spad != S:
        # Zero padding is harmless: sums over padded spatial rows add 0, and we
        # divide by the true S; padded batch rows are sliced off at the end.
        x_bsc = jnp.pad(x_bsc, ((0, Bpad - B), (0, Spad - S), (0, 0)))

    w_t = weight.T.astype(jnp.float32)          # (C, N)
    b_2d = bias.reshape(1, N).astype(jnp.float32)
    inv_s = float(1.0 / S)                      # static, baked into the kernel

    grid = (Bpad // Bt, Spad // St)

    # VMEM budget derived from actual tile footprint (double-buffered x) with
    # headroom; clamped so it is safe on v5e (16 MiB default) and v7x (64 MiB phys).
    vmem_bytes = (2 * Bt * St * C * itemsize        # x tiles, double buffered
                  + 2 * C * N * 4 + 2 * N * 4       # weight + bias
                  + 2 * Bt * N * 4                  # output block
                  + Bt * C * 4)                     # accumulator scratch
    vmem_limit = int(min(max(2 * vmem_bytes, 32 * 1024 * 1024),
                         64 * 1024 * 1024))

    cost = pl.CostEstimate(
        flops=int(B * C * S + 2 * B * C * N),
        transcendentals=0,
        bytes_accessed=int(B * S * C * itemsize + C * N * 4 + N * 4
                           + B * N * itemsize),
    )

    kernel = functools.partial(_classifier_head_kernel, inv_s=inv_s)

    out = pl.pallas_call(
        kernel,
        out_shape=jax.ShapeDtypeStruct((Bpad, N), x.dtype),
        grid_spec=pltpu.PrefetchScalarGridSpec(
            num_scalar_prefetch=0,
            grid=grid,
            in_specs=[
                pl.BlockSpec((Bt, St, C), lambda i, k: (i, k, 0)),
                pl.BlockSpec((C, N), lambda i, k: (0, 0)),
                pl.BlockSpec((1, N), lambda i, k: (0, 0)),
            ],
            out_specs=pl.BlockSpec((Bt, N), lambda i, k: (i, 0)),
            scratch_shapes=[pltpu.VMEM((Bt, C), jnp.float32)],
        ),
        compiler_params=pltpu.CompilerParams(
            dimension_semantics=("parallel", "arbitrary"),
            vmem_limit_bytes=vmem_limit,
        ),
        cost_estimate=cost,
    )(x_bsc, w_t, b_2d)

    return out[:B]


def _reference(x, weight, bias):
    pooled = jnp.mean(x.astype(jnp.float32), axis=(2, 3, 4))
    return pooled @ weight.T.astype(jnp.float32) + bias.astype(jnp.float32)


if __name__ == "__main__":
    # Small shapes consistent with the module: 5-D input (B, C, D, H, W),
    # input_dim = C, classifier -> num_classes logits.
    B, C, D, H, W = 2, 32, 4, 4, 4
    num_classes = 8

    key = jax.random.PRNGKey(0)
    kx, kw, kb = jax.random.split(key, 3)

    x = jax.random.normal(kx, (B, C, D, H, W), dtype=jnp.float32)
    weight = jax.random.normal(kw, (num_classes, C), dtype=jnp.float32) * 0.1
    bias = jax.random.normal(kb, (num_classes,), dtype=jnp.float32) * 0.1

    ref = _reference(x, weight, bias)

    # 1) Default tiling (single spatial tile at these toy shapes).
    logits = classifier_head(x, weight, bias)
    jax.block_until_ready(logits)
    assert logits.shape == (B, num_classes)
    assert jnp.allclose(logits, ref, atol=1e-4, rtol=1e-4), "mismatch (default tiles)"

    # 2) Tiny tile target to force a multi-step spatial reduction and exercise
    #    the zero-init / accumulate / finalize path.
    logits_small = classifier_head(x, weight, bias, target_tile_bytes=8192)
    jax.block_until_ready(logits_small)
    assert jnp.allclose(logits_small, ref, atol=1e-4, rtol=1e-4), "mismatch (gridded)"

    print("KERNEL_OK")
</pallas_src>

<mosaic_0001>
module attributes {stable_mosaic.version = 11 : i64} {
  func.func @_classifier_head_kernel(%arg0: i32, %arg1: i32, %arg2: memref<2x64x32xf32, #tpu.memory_space<vmem>>, %arg3: memref<32x8xf32, #tpu.memory_space<vmem>>, %arg4: memref<1x8xf32, #tpu.memory_space<vmem>>, %arg5: memref<2x8xf32, #tpu.memory_space<vmem>>, %arg6: memref<2x32xf32, #tpu.memory_space<vmem>>) attributes {dimension_semantics = [#tpu.dimension_semantics<parallel>, #tpu.dimension_semantics<arbitrary>], iteration_bounds = array<i64: 1, 1>, scalar_prefetch = 0 : i64, scratch_operands = 1 : i64, tpu.core_type = #tpu.core_type<tc>, window_params = [{transform_indices = @transform_0, window_bounds = array<i64: 2, 64, 32>}, {pipeline_mode = #tpu.pipeline_mode<synchronous>, transform_indices = @transform_1, window_bounds = array<i64: 32, 8>}, {pipeline_mode = #tpu.pipeline_mode<synchronous>, transform_indices = @transform_2, window_bounds = array<i64: 1, 8>}, {transform_indices = @transform_3, window_bounds = array<i64: 2, 8>}]} {
    %c0_i32 = arith.constant 0 : i32
    %0 = arith.cmpi eq, %arg1, %c0_i32 : i32
    %1 = arith.extui %0 : i1 to i32
    %c0_i32_0 = arith.constant 0 : i32
    %2 = arith.cmpi ne, %1, %c0_i32_0 : i32
    scf.if %2 {
      %cst_9 = arith.constant 0.000000e+00 : f32
      %11 = vector.broadcast %cst_9 : f32 to vector<2x32xf32>
      %c0_10 = arith.constant 0 : index
      %c0_11 = arith.constant 0 : index
      %12 = vector.load %arg6[%c0_10, %c0_11] : memref<2x32xf32, #tpu.memory_space<vmem>>, vector<2x32xf32>
      tpu.vector_store %arg6[%c0_10, %c0_11], %11 {strides = array<i32>} : memref<2x32xf32, #tpu.memory_space<vmem>>, vector<2x32xf32>,
    } else {
    }
    %c0 = arith.constant 0 : index
    %c0_1 = arith.constant 0 : index
    %3 = vector.load %arg6[%c0, %c0_1] : memref<2x32xf32, #tpu.memory_space<vmem>>, vector<2x32xf32>
    %c0_2 = arith.constant 0 : index
    %c0_3 = arith.constant 0 : index
    %c0_4 = arith.constant 0 : index
    %4 = vector.load %arg2[%c0_2, %c0_3, %c0_4] : memref<2x64x32xf32, #tpu.memory_space<vmem>>, vector<2x64x32xf32>
    %cst = arith.constant dense<0.000000e+00> : vector<2x32xf32>
    %5 = vector.multi_reduction <add>, %4, %cst [1] : vector<2x64x32xf32> to vector<2x32xf32>
    %6 = arith.addf %3, %5 : vector<2x32xf32>
    %c0_5 = arith.constant 0 : index
    %c0_6 = arith.constant 0 : index
    %7 = vector.load %arg6[%c0_5, %c0_6] : memref<2x32xf32, #tpu.memory_space<vmem>>, vector<2x32xf32>
    tpu.vector_store %arg6[%c0_5, %c0_6], %6 {strides = array<i32>} : memref<2x32xf32, #tpu.memory_space<vmem>>, vector<2x32xf32>,
    %c0_i32_7 = arith.constant 0 : i32
    %8 = arith.cmpi eq, %arg1, %c0_i32_7 : i32
    %9 = arith.extui %8 : i1 to i32
    %c0_i32_8 = arith.constant 0 : i32
    %10 = arith.cmpi ne, %9, %c0_i32_8 : i32
    scf.if %10 {
      %c0_9 = arith.constant 0 : index
      %c0_10 = arith.constant 0 : index
      %11 = vector.load %arg6[%c0_9, %c0_10] : memref<2x32xf32, #tpu.memory_space<vmem>>, vector<2x32xf32>
      %cst_11 = arith.constant 1.562500e-02 : f32
      %12 = vector.broadcast %cst_11 : f32 to vector<2x32xf32>
      %13 = arith.mulf %11, %12 : vector<2x32xf32>
      %c0_12 = arith.constant 0 : index
      %c0_13 = arith.constant 0 : index
      %14 = vector.load %arg3[%c0_12, %c0_13] : memref<32x8xf32, #tpu.memory_space<vmem>>, vector<32x8xf32>
      %cst_14 = arith.constant dense<0.000000e+00> : vector<2x8xf32>
      %15 = tpu.matmul %13, %14, %cst_14 {dimension_numbers = #tpu.dot_dimension_numbers<[1], [0], [0], [1], [0, 0, 1, 1], [], []>} : vector<2x32xf32>, vector<32x8xf32>, vector<2x8xf32> -> vector<2x8xf32>
      %c0_15 = arith.constant 0 : index
      %c0_16 = arith.constant 0 : index
      %16 = vector.load %arg4[%c0_15, %c0_16] : memref<1x8xf32, #tpu.memory_space<vmem>>, vector<1x8xf32>
      %17 = vector.broadcast %16 : vector<1x8xf32> to vector<2x8xf32>
      %18 = arith.addf %15, %17 : vector<2x8xf32>
      %c0_17 = arith.constant 0 : index
      %c0_18 = arith.constant 0 : index
      %19 = vector.load %arg5[%c0_17, %c0_18] : memref<2x8xf32, #tpu.memory_space<vmem>>, vector<2x8xf32>
      tpu.vector_store %arg5[%c0_17, %c0_18], %18 {strides = array<i32>} : memref<2x8xf32, #tpu.memory_space<vmem>>, vector<2x8xf32>,
    } else {
    }
    return
  }
  func.func @transform_0(%arg0: i32, %arg1: i32) -> (i32, i32, i32) {
    %c0_i32 = arith.constant 0 : i32
    %c0_i32_0 = arith.constant 0 : i32
    return %arg0, %arg1, %c0_i32 : i32, i32, i32
  }
  func.func @transform_1(%arg0: i32, %arg1: i32) -> (i32, i32) {
    %c0_i32 = arith.constant 0 : i32
    %c0_i32_0 = arith.constant 0 : i32
    %c0_i32_1 = arith.constant 0 : i32
    return %c0_i32, %c0_i32_0 : i32, i32
  }
  func.func @transform_2(%arg0: i32, %arg1: i32) -> (i32, i32) {
    %c0_i32 = arith.constant 0 : i32
    %c0_i32_0 = arith.constant 0 : i32
    %c0_i32_1 = arith.constant 0 : i32
    return %c0_i32, %c0_i32_0 : i32, i32
  }
  func.func @transform_3(%arg0: i32, %arg1: i32) -> (i32, i32) {
    %c0_i32 = arith.constant 0 : i32
    %c0_i32_0 = arith.constant 0 : i32
    return %arg0, %c0_i32 : i32, i32
  }
}

</mosaic_0001>

<bundles_post_ra>
// kernel: tpu_custom_call.1
= control target key start
LH: loop header
LB: loop body
LE: loop exit
PB: predicated region body
PF: predicated region fallthrough
CT: control target
= control target key end

     0   :  { %vm19_vm0 = vcmask 254976   ;;  %vm38_vm1 = vcmask 261120   ;;  %v173_v2 = vmov 0.0   ;;  %s280_s0 = inlined_call_operand.vmem [shape: f32[2,64,32], index: 0, kind: input, shape index: {}]   ;;  %s281_s1 = inlined_call_operand.vmem [shape: f32[32,8], index: 1, kind: input, shape index: {}]   ;;  %s282_s2 = inlined_call_operand.vmem [shape: f32[1,8], index: 2, kind: input, shape index: {}]   ;;  %s283_s3 = inlined_call_operand.hbm [shape: f32[2,8], index: 3, kind: output, shape index: {}]  }
   0x1   :  { %v97_v0 = vld [vmem:[%s281_s1 + $0x18] sm:$0xff]  ;;  %v96_v1 = vld [vmem:[%s281_s1 + $0x10] sm:$0xff]  ;;  %20 = vst.msk [vmem:[#allocation2] sm:$0x3] %vm19_vm0, %v173_v2  ;;  %v22_v3 = vld [vmem:[%s280_s0] sm:$0xff] }
   0x2   :  { %117 = vmatpush.msra.mxu0 %v97_v0  ;;  %v23_v4 = vld [vmem:[%s280_s0 + $0x8] sm:$0xff]  ;;  %v24_v6 = vld [vmem:[%s280_s0 + $0x10] sm:$0xff]  ;;  %v25_v7 = vld [vmem:[%s280_s0 + $0x18] sm:$0xff]  ;;  %v39_v8 = vsel %vm38_vm1, %v22_v3, 0.0 }
   0x3   :  { %v95_v5 = vld [vmem:[%s281_s1 + $0x8] sm:$0xff]  ;;  %v40_v9 = vsel %vm38_vm1, %v23_v4, 0.0  ;;  %v94_v10 = vld [vmem:[%s281_s1] sm:$0xff]  ;;  %v42_v13 = vsel %vm38_vm1, %v24_v6, 0.0  ;;  %v32_v16 = vld [vmem:[%s280_s0 + $0x50] sm:$0xff]  ;;  %v44_v17 = vsel %vm38_vm1, %v25_v7, 0.0 }
   0x4   :  { %118 = vmatpush.msra.mxu0 %v96_v1  ;;  %v26_v11 = vld [vmem:[%s280_s0 + $0x20] sm:$0xff]  ;;  %v41_v12 = vadd.f32 %v40_v9, %v39_v8  ;;  %v31_v15 = vld [vmem:[%s280_s0 + $0x48] sm:$0xff]  ;;  %v33_v19 = vld [vmem:[%s280_s0 + $0x58] sm:$0xff]  ;;  %v63_v23 = vsel %vm38_vm1, %v32_v16, 0.0 }
   0x5   :  { %v30_v14 = vld [vmem:[%s280_s0 + $0x40] sm:$0xff]  ;;  %v27_v18 = vld [vmem:[%s280_s0 + $0x28] sm:$0xff]  ;;  %v61_v22 = vsel %vm38_vm1, %v31_v15, 0.0  ;;  %v46_v25 = vsel %vm38_vm1, %v26_v11, 0.0  ;;  %v28_v27 = vld [vmem:[%s280_s0 + $0x30] sm:$0xff]  ;;  %v65_v29 = vsel %vm38_vm1, %v33_v19, 0.0 }
   0x6   :  { %119 = vmatpush.msra.mxu0 %v95_v5  ;;  %v43_v20 = vadd.f32 %v42_v13, %v41_v12  ;;  %v60_v21 = vsel %vm38_vm1, %v30_v14, 0.0  ;;  %v34_v24 = vld [vmem:[%s280_s0 + $0x60] sm:$0xff] }
   0x7   :  { %v62_v26 = vadd.f32 %v61_v22, %v60_v21 }
   0x8   :  { %120 = vmatpush.msra.mxu0 %v94_v10  ;;  %v45_v28 = vadd.f32 %v44_v17, %v43_v20 }
   0x9   :  { %8 = vsyncpa [#allocation4], 0  ;;  %v35_v30 = vld [vmem:[%s280_s0 + $0x68] sm:$0xff]  ;;  %v48_v31 = vsel %vm38_vm1, %v27_v18, 0.0  ;;  %v64_v32 = vadd.f32 %v63_v23, %v62_v26  ;;  %v29_v33 = vld [vmem:[%s280_s0 + $0x38] sm:$0xff]  ;;  %v67_v35 = vsel %vm38_vm1, %v34_v24, 0.0 }
   0xa   :  { %v47_v34 = vadd.f32 %v46_v25, %v45_v28  ;;  %v36_v36 = vld [vmem:[%s280_s0 + $0x70] sm:$0xff]  ;;  %v50_v37 = vsel %vm38_vm1, %v28_v27, 0.0  ;;  %v69_v40 = vsel %vm38_vm1, %v35_v30, 0.0  ;;  %v37_v41 = vld [vmem:[%s280_s0 + $0x78] sm:$0xff]  ;;  %v52_v42 = vsel %vm38_vm1, %v29_v33, 0.0  ;;  %s174_s25 = smov [#allocation3]  }
   0xb   :  { %v66_v38 = vadd.f32 %v65_v29, %v64_v32  ;;  %v71_v45 = vsel %vm38_vm1, %v36_v36, 0.0  ;;  %v73_v48 = vsel %vm38_vm1, %v37_v41, 0.0  ;;  %vm83_vm2 = vcmask 1041409   ;;  %v21_v62 = vld [vmem:[#allocation2] sm:$0x3]  ;;  %s132_s26 = sshll.u32 %s174_s25, 4  ;;  %s133_s26 = int_to_ptr.vmem [resolvable:$true] %s132_s26 }
   0xc   :  { %v49_v39 = vadd.f32 %v48_v31, %v47_v34  ;;  %v146_v4 = vld [vmem:[%s282_s2] ss:$0 sm:$0xff]  ;;  %s134_s29 = sshll.u32 %s283_s3, 4  ;;  %vm125_vm3 = vcmask 58368   ;;  %s135_s29 = int_to_ptr.hbm [resolvable:$true] %s134_s29 }
   0xd   :  { %v68_v43 = vadd.f32 %v67_v35, %v66_v38 }
   0xe   :  { %v51_v44 = vadd.f32 %v50_v37, %v49_v39 }
   0xf   :  { %v70_v46 = vadd.f32 %v69_v40, %v68_v43 }
  0x10   :  { %v53_v47 = vadd.f32 %v52_v42, %v51_v44 }
  0x11   :  { %v72_v49 = vadd.f32 %v71_v45, %v70_v46 }
  0x12   :  { %v54_v50 = vrot.slane %v53_v47, 4 }
  0x13   :  { %v74_v51 = vadd.f32 %v73_v48, %v72_v49 }
  0x14   :  { %v55_v52 = vadd.f32 %v54_v50, %v53_v47 }
  0x15   :  { %v75_v53 = vrot.slane %v74_v51, 4 }
  0x16   :  { %v56_v54 = vrot.slane %v55_v52, 2 }
  0x17   :  { %v76_v55 = vadd.f32 %v75_v53, %v74_v51 }
  0x18   :  { %v57_v56 = vadd.f32 %v56_v54, %v55_v52 }
  0x19   :  { %v77_v57 = vrot.slane %v76_v55, 2 }
  0x1a   :  { %v58_v58 = vrot.slane %v57_v56, 1 }
  0x1b   :  { %v78_v59 = vadd.f32 %v77_v57, %v76_v55 }
  0x1c   :  { %v59_v60 = vadd.f32 %v58_v58, %v57_v56 }
  0x1d   :  { %v79_v61 = vrot.slane %v78_v59, 1 }
  0x1f   :  { %v80_v63 = vadd.f32 %v79_v61, %v78_v59 }
  0x21   :  { %v84_v0 = vsel %vm83_vm2, %v80_v63, %v59_v60 }
  0x22   :  { %v86_v1 = vadd.f32 %v84_v0, %v21_v62 }
  0x24   :  { %88 = vst.msk [vmem:[#allocation2] sm:$0x3] %vm19_vm0, %v86_v1 }
  0x2b   :  { %v92_v2 = vld [vmem:[#allocation2] sm:$0x3] }
  0x2c   :  { %v93_v3 = vmul.f32 0.015625, %v92_v2 }
  0x2e   :  { %143 = vmatmul.msk.f32.vlgmr.msra.gmra.mxu0 %vm38_vm1, %v93_v3 }
  0xab   :  { %v122_v5 = vpop.f32.mrf.mxu0 }
  0xac   :  { %v123_v6 = vadd.f32 %v146_v4, %v122_v5 }
  0xae   :  { %126 = vst.msk [vmem:[#allocation3] sm:$0x3] %vm125_vm3, %v123_v6 }
  0xaf   :  { %137 = dma.vmem_to_hbm [thread:$0]  %s133_s26, 32, %s135_s29, [#allocation4]  }
  0xb0   :  { %171 = dma.done.wait [#allocation4], 32  }
  0xb1   :  { %172 = vsyncadd [#allocation4], 4294967264 }
  0xb2   :  { %142 = vsyncpa [#allocation4], 1 }

</bundles_post_ra>
